<compile_context>
chip_gen: v7x
topology: tpu7x:2x2x1
jax: 0.10.0
libtpu: 0.0.40
codegen_flags: <defaults>
</compile_context>

<pallas_src>
import jax
import jax.numpy as jnp
import numpy as np
from jax import lax
from jax.experimental import pallas as pl
from jax.experimental.pallas import tpu as pltpu

LANE = 128


def _rup(x, m):
    return ((x + m - 1) // m) * m


# ---------------------------------------------------------------------------
# Kernel 1: per-batch image sum (lane-dense, tiled reduction over rows).
# ---------------------------------------------------------------------------
def img_sum_kernel(img_ref, out_ref):
    t = pl.program_id(1)

    @pl.when(t == 0)
    def _():
        out_ref[...] = jnp.zeros_like(out_ref)

    out_ref[...] = out_ref[...] + jnp.sum(img_ref[...])


def image_batch_sums(images):
    """Returns (per-batch sum of all image elements (B,), total element count)."""
    B = images.shape[0]
    total = int(np.prod(images.shape[1:]))
    rows = -(-total // LANE)
    # Tile of <=512 rows keeps the double-buffered block tiny (<=512 KiB),
    # safe for the smaller v7x VMEM while still approaching HBM roofline.
    tile_r = 512 if rows >= 512 else _rup(rows, 8)
    rows_pad = _rup(rows, tile_r)
    flat = images.reshape(B, total).astype(jnp.float32)
    pad = rows_pad * LANE - total
    if pad:
        flat = jnp.pad(flat, ((0, 0), (0, pad)))
    img3 = flat.reshape(B, rows_pad, LANE)                    # lane-dense layout
    n_tiles = rows_pad // tile_r

    out = pl.pallas_call(
        img_sum_kernel,
        out_shape=jax.ShapeDtypeStruct((B, 1, 1), jnp.float32),
        grid=(B, n_tiles),
        in_specs=[pl.BlockSpec((1, tile_r, LANE), lambda b, t: (b, t, 0))],
        out_specs=pl.BlockSpec((1, 1, 1), lambda b, t: (b, 0, 0)),
        compiler_params=pltpu.CompilerParams(
            dimension_semantics=("parallel", "arbitrary")),
    )(img3)
    return out.reshape(B), total


# ---------------------------------------------------------------------------
# Kernel 2 (built inside the wrapper): pose transform + backbone + head,
# vectorized over all key points, 128 rows (poses) per grid step.
# ---------------------------------------------------------------------------
def keypoint_feature_forward(poses, key_points, images, projection_matrices, params):
    # TODO(synk): pixel-aligned feature sampling via projection_matrices
    # (frame.backbone's grid_sample) is external to the module source; the
    # projection matrices are unused by the synthetic backbone.
    del projection_matrices
    w1, b1, w2, b2, vs, wh1, bh1, wh2, bh2 = params
    B, N, _ = poses.shape
    P = key_points.shape[2]
    H1 = w1.shape[1]
    F = w2.shape[1]
    H2 = wh1.shape[1]
    assert max(P, P * H1, P * F, H2) <= LANE, "packed slab assumes widths <= 128"

    # ---- stage 1: pooled image scalar per batch element ----
    img_sum, img_total = image_batch_sums(images)             # (B,), python int
    inv_total = 1.0 / float(img_total)

    # ---- stage 2: collapse (B, N) -> rows, append per-row image sum ----
    ROW_TILE = 128
    rows_real = B * N
    n_row_tiles = max(2, -(-rows_real // ROW_TILE))           # >=2: both v7x cores busy
    rows_pad = n_row_tiles * ROW_TILE
    pose_rows = poses.reshape(rows_real, 7).astype(jnp.float32)
    img_rows = jnp.repeat(img_sum, N).reshape(rows_real, 1)
    rows = jnp.concatenate([pose_rows, img_rows], axis=1)     # (rows_real, 8)
    rows = jnp.pad(rows, ((0, rows_pad - rows_real), (0, 0)))

    # ---- pack all weights into one lane-dense (PAR_ROWS, 128) slab ----
    # Block-diagonal (over key points) weights so the backbone is one pass
    # over all P points instead of a P-way unroll of tiny matmuls.
    eyeP = jnp.eye(P, dtype=jnp.float32)
    W1_all = jnp.einsum("pq,ch->cpqh", eyeP, w1).reshape(3, P, P * H1)  # per-coord
    W2_big = jnp.einsum("pq,jk->pjqk", eyeP, w2).reshape(P * H1, P * F)
    b1_big = jnp.tile(b1, (1, P))                             # (1, P*H1)
    b2_big = jnp.tile(b2, (1, P))                             # (1, P*F)
    vs_big = jnp.tile(vs, (1, P))                             # (1, P*F)
    kp_t = key_points.reshape(P, 3).T.astype(jnp.float32)     # (3, P)

    RP = _rup(P, 8)
    OFF_W1X, OFF_W1Y, OFF_W1Z = 0, RP, 2 * RP
    OFF_W2 = 3 * RP
    OFF_WH1 = OFF_W2 + _rup(P * H1, 8)
    OFF_B1 = OFF_WH1 + _rup(P * F, 8)
    OFF_B2 = OFF_B1 + 1
    OFF_VS = OFF_B2 + 1
    OFF_BH1 = OFF_VS + 1
    OFF_WH2 = OFF_BH1 + 1
    OFF_BH2 = OFF_WH2 + 1
    OFF_KP = OFF_BH2 + 1
    PAR_ROWS = _rup(OFF_KP + 3, 8)
    PH1, PF = P * H1, P * F

    def _pad_seg(x, n_rows):
        x = x.astype(jnp.float32)
        return jnp.pad(x, ((0, n_rows - x.shape[0]), (0, LANE - x.shape[1])))

    par = jnp.concatenate([
        _pad_seg(W1_all[0], RP), _pad_seg(W1_all[1], RP), _pad_seg(W1_all[2], RP),
        _pad_seg(W2_big, _rup(PH1, 8)),
        _pad_seg(wh1, _rup(PF, 8)),
        _pad_seg(b1_big, 1), _pad_seg(b2_big, 1), _pad_seg(vs_big, 1),
        _pad_seg(bh1, 1), _pad_seg(wh2.T, 1), _pad_seg(bh2, 1),
        _pad_seg(kp_t, 3),
    ], axis=0)
    par = jnp.pad(par, ((0, PAR_ROWS - par.shape[0]), (0, 0)))

    def row_kernel(rows_ref, par_ref, out_ref):
        r = rows_ref[...]                                     # (ROW_TILE, 8)
        tx = r[:, 0:1]; ty = r[:, 1:2]; tz = r[:, 2:3]
        qw = r[:, 3:4]; qx = r[:, 4:5]; qy = r[:, 5:6]; qz = r[:, 6:7]
        img_mean = r[:, 7:8] * inv_total                      # (R, 1)

        kpx = par_ref[OFF_KP + 0:OFF_KP + 1, 0:P]             # (1, P)
        kpy = par_ref[OFF_KP + 1:OFF_KP + 2, 0:P]
        kpz = par_ref[OFF_KP + 2:OFF_KP + 3, 0:P]

        # quaternion_apply (real-first): out = (w^2-|u|^2) v + 2(u.v)u + 2w(u x v)
        s = qw * qw - (qx * qx + qy * qy + qz * qz)           # (R, 1)
        udv = qx * kpx + qy * kpy + qz * kpz                  # (R, P)
        cx = qy * kpz - qz * kpy
        cy = qz * kpx - qx * kpz
        cz = qx * kpy - qy * kpx
        px = s * kpx + 2.0 * udv * qx + 2.0 * qw * cx + tx    # (R, P)
        py = s * kpy + 2.0 * udv * qy + 2.0 * qw * cy + ty
        pz = s * kpz + 2.0 * udv * qz + 2.0 * qw * cz + tz

        # backbone layer 1, vectorized over all P points (block-diag weights)
        w1x = par_ref[OFF_W1X:OFF_W1X + P, 0:PH1]
        w1y = par_ref[OFF_W1Y:OFF_W1Y + P, 0:PH1]
        w1z = par_ref[OFF_W1Z:OFF_W1Z + P, 0:PH1]
        b1b = par_ref[OFF_B1:OFF_B1 + 1, 0:PH1]
        h1 = jnp.maximum(
            jnp.dot(px, w1x, preferred_element_type=jnp.float32)
            + jnp.dot(py, w1y, preferred_element_type=jnp.float32)
            + jnp.dot(pz, w1z, preferred_element_type=jnp.float32)
            + b1b, 0.0)                                       # (R, P*H1)

        # backbone layer 2 + pooled-image bias (hoisted: computed once per tile)
        w2b = par_ref[OFF_W2:OFF_W2 + PH1, 0:PF]
        bias = (par_ref[OFF_B2:OFF_B2 + 1, 0:PF]
                + img_mean * par_ref[OFF_VS:OFF_VS + 1, 0:PF])  # (R, P*F)
        feat = jnp.dot(h1, w2b, preferred_element_type=jnp.float32) + bias

        # head
        wh1b = par_ref[OFF_WH1:OFF_WH1 + PF, 0:H2]
        bh1b = par_ref[OFF_BH1:OFF_BH1 + 1, 0:H2]
        h2 = jnp.maximum(
            jnp.dot(feat, wh1b, preferred_element_type=jnp.float32) + bh1b, 0.0)

        wh2t = par_ref[OFF_WH2:OFF_WH2 + 1, 0:H2]             # (1, H2)
        bh2b = par_ref[OFF_BH2:OFF_BH2 + 1, 0:1]              # (1, 1)
        # (1,H2) x (R,H2)^T -> (1,R): rows land on the lane axis -> unmasked store
        y = lax.dot_general(wh2t, h2, (((1,), (1,)), ((), ())),
                            preferred_element_type=jnp.float32) + bh2b
        out_ref[...] = y[None]                                # (1, 1, ROW_TILE)

    out = pl.pallas_call(
        row_kernel,
        out_shape=jax.ShapeDtypeStruct((n_row_tiles, 1, ROW_TILE), jnp.float32),
        grid=(n_row_tiles,),
        in_specs=[
            pl.BlockSpec((ROW_TILE, 8), lambda t: (t, 0)),
            pl.BlockSpec((PAR_ROWS, LANE), lambda t: (0, 0)),
        ],
        out_specs=pl.BlockSpec((1, 1, ROW_TILE), lambda t: (t, 0, 0)),
        compiler_params=pltpu.CompilerParams(dimension_semantics=("parallel",)),
    )(rows, par)

    return out.reshape(rows_pad)[:rows_real].reshape(B, N)


# ---------------------------------------------------------------------------
# Pure-JAX reference (mirrors the PyTorch forward with the synthetic backbone/head)
# ---------------------------------------------------------------------------
def _quaternion_apply(q, v):
    w, x, y, z = q[..., 0], q[..., 1], q[..., 2], q[..., 3]
    vx, vy, vz = v[..., 0], v[..., 1], v[..., 2]
    uu = x * x + y * y + z * z
    ww = w * w
    udv = x * vx + y * vy + z * vz
    cx = y * vz - z * vy
    cy = z * vx - x * vz
    cz = x * vy - y * vx
    rx = (ww - uu) * vx + 2.0 * udv * x + 2.0 * w * cx
    ry = (ww - uu) * vy + 2.0 * udv * y + 2.0 * w * cy
    rz = (ww - uu) * vz + 2.0 * udv * z + 2.0 * w * cz
    return jnp.stack([rx, ry, rz], axis=-1)


def forward_reference(poses, key_points, images, params):
    (w1, b1, w2, b2, vs, wh1, bh1, wh2, bh2) = params
    B, N, _ = poses.shape
    P = key_points.shape[2]
    poses_rep = jnp.broadcast_to(poses[:, :, None, :], (B, N, P, 7))
    pts = _quaternion_apply(poses_rep[..., 3:], key_points) + poses_rep[..., :3]
    pts = pts.reshape(B, N * P, 3)
    # backbone
    h1 = jax.nn.relu(pts @ w1 + b1)                                  # (B, N*P, H1)
    feat = h1 @ w2 + b2                                              # (B, N*P, F)
    V = images.shape[1]
    img_pool = images.reshape(B, V, -1).mean(axis=-1)                # (B, V)
    feats_views = feat[:, None] + img_pool[:, :, None, None] * vs    # (B, V, N*P, F)
    features = feats_views.mean(axis=1).reshape(B, N, P * w2.shape[1])
    # head
    h2 = jax.nn.relu(features @ wh1 + bh1)
    y = h2 @ wh2 + bh2                                               # (B, N, 1)
    return y[..., 0]


# ---------------------------------------------------------------------------
if __name__ == "__main__":
    B, N, P = 2, 8, 5
    V, C, IMGH, IMGW = 2, 4, 16, 16
    H1, F, H2 = 16, 8, 32

    key = jax.random.PRNGKey(0)
    ks = jax.random.split(key, 13)

    pos = jax.random.normal(ks[0], (B, N, 3), jnp.float32) * 0.3
    quat = jax.random.normal(ks[1], (B, N, 4), jnp.float32)
    quat = quat / jnp.linalg.norm(quat, axis=-1, keepdims=True)
    poses = jnp.concatenate([pos, quat], axis=-1).astype(jnp.float32)        # (B, N, 7)

    key_points = (jax.random.normal(ks[2], (1, 1, P, 3), jnp.float32) * 0.05)
    images = jax.random.normal(ks[3], (B, V, C, IMGH, IMGW), jnp.float32)
    projection_matrices = jnp.tile(jnp.eye(4, dtype=jnp.float32), (B, V, 1, 1))

    params = (
        (jax.random.normal(ks[4], (3, H1), jnp.float32) * 0.5),     # w1
        (jax.random.normal(ks[5], (1, H1), jnp.float32) * 0.1),     # b1
        (jax.random.normal(ks[6], (H1, F), jnp.float32) * 0.3),     # w2
        (jax.random.normal(ks[7], (1, F), jnp.float32) * 0.1),      # b2
        (jax.random.normal(ks[8], (1, F), jnp.float32) * 0.1),      # view_scale
        (jax.random.normal(ks[9], (P * F, H2), jnp.float32) * 0.2), # wh1
        (jax.random.normal(ks[10], (1, H2), jnp.float32) * 0.1),    # bh1
        (jax.random.normal(ks[11], (H2, 1), jnp.float32) * 0.3),    # wh2
        (jax.random.normal(ks[12], (1, 1), jnp.float32) * 0.1),     # bh2
    )

    out = keypoint_feature_forward(poses, key_points, images, projection_matrices, params)
    out = jax.block_until_ready(out)

    ref = jax.block_until_ready(forward_reference(poses, key_points, images, params))
    assert out.shape == (B, N), out.shape
    assert np.allclose(np.asarray(out), np.asarray(ref), rtol=1e-3, atol=1e-3), (
        np.abs(np.asarray(out) - np.asarray(ref)).max())

    print("KERNEL_OK")
</pallas_src>

<mosaic_0001>
module attributes {stable_mosaic.version = 11 : i64} {
  func.func @img_sum_kernel(%arg0: i32, %arg1: i32, %arg2: memref<1x16x128xf32, #tpu.memory_space<vmem>>, %arg3: memref<1x1x1xf32, #tpu.memory_space<vmem>>) attributes {dimension_semantics = [#tpu.dimension_semantics<parallel>, #tpu.dimension_semantics<arbitrary>], iteration_bounds = array<i64: 2, 1>, scalar_prefetch = 0 : i64, scratch_operands = 0 : i64, tpu.core_type = #tpu.core_type<tc>, window_params = [{transform_indices = @transform_0, window_bounds = array<i64: 1, 16, 128>}, {transform_indices = @transform_1, window_bounds = array<i64: 1, 1, 1>}]} {
    %c0_i32 = arith.constant 0 : i32
    %0 = arith.cmpi eq, %arg1, %c0_i32 : i32
    %1 = arith.extui %0 : i1 to i32
    %c0_i32_0 = arith.constant 0 : i32
    %2 = arith.cmpi ne, %1, %c0_i32_0 : i32
    scf.if %2 {
      %cst_9 = arith.constant 0.000000e+00 : f32
      %12 = vector.broadcast %cst_9 : f32 to vector<1x1x1xf32>
      %c0_10 = arith.constant 0 : index
      %c0_11 = arith.constant 0 : index
      %c0_12 = arith.constant 0 : index
      %13 = vector.load %arg3[%c0_10, %c0_11, %c0_12] : memref<1x1x1xf32, #tpu.memory_space<vmem>>, vector<1x1x1xf32>
      tpu.vector_store %arg3[%c0_10, %c0_11, %c0_12], %12 {strides = array<i32>} : memref<1x1x1xf32, #tpu.memory_space<vmem>>, vector<1x1x1xf32>,
    } else {
    }
    %c0 = arith.constant 0 : index
    %c0_1 = arith.constant 0 : index
    %c0_2 = arith.constant 0 : index
    %3 = vector.load %arg3[%c0, %c0_1, %c0_2] : memref<1x1x1xf32, #tpu.memory_space<vmem>>, vector<1x1x1xf32>
    %c0_3 = arith.constant 0 : index
    %c0_4 = arith.constant 0 : index
    %c0_5 = arith.constant 0 : index
    %4 = vector.load %arg2[%c0_3, %c0_4, %c0_5] : memref<1x16x128xf32, #tpu.memory_space<vmem>>, vector<1x16x128xf32>
    %5 = vector.shape_cast %4 : vector<1x16x128xf32> to vector<1x1x16x128xf32>
    %cst = arith.constant dense<0.000000e+00> : vector<1xf32>
    %6 = vector.multi_reduction <add>, %5, %cst [1, 2, 3] : vector<1x1x16x128xf32> to vector<1xf32>
    %7 = vector.shape_cast %6 : vector<1xf32> to vector<1x1x1x1xf32>
    %8 = vector.extract %7[0, 0, 0, 0] : f32 from vector<1x1x1x1xf32>
    %9 = vector.broadcast %8 : f32 to vector<1x1x1xf32>
    %10 = arith.addf %3, %9 : vector<1x1x1xf32>
    %c0_6 = arith.constant 0 : index
    %c0_7 = arith.constant 0 : index
    %c0_8 = arith.constant 0 : index
    %11 = vector.load %arg3[%c0_6, %c0_7, %c0_8] : memref<1x1x1xf32, #tpu.memory_space<vmem>>, vector<1x1x1xf32>
    tpu.vector_store %arg3[%c0_6, %c0_7, %c0_8], %10 {strides = array<i32>} : memref<1x1x1xf32, #tpu.memory_space<vmem>>, vector<1x1x1xf32>,
    return
  }
  func.func @transform_0(%arg0: i32, %arg1: i32) -> (i32, i32, i32) {
    %c0_i32 = arith.constant 0 : i32
    %c0_i32_0 = arith.constant 0 : i32
    return %arg0, %arg1, %c0_i32 : i32, i32, i32
  }
  func.func @transform_1(%arg0: i32, %arg1: i32) -> (i32, i32, i32) {
    %c0_i32 = arith.constant 0 : i32
    %c0_i32_0 = arith.constant 0 : i32
    %c0_i32_1 = arith.constant 0 : i32
    return %arg0, %c0_i32, %c0_i32_0 : i32, i32, i32
  }
}

</mosaic_0001>

<bundles_post_ra>
// kernel: tpu_custom_call.1
= control target key start
LH: loop header
LB: loop body
LE: loop exit
PB: predicated region body
PF: predicated region fallthrough
CT: control target
= control target key end

     0   :  { %6 = vsyncpa [#allocation3], 0  ;;  %s537_s0 = inlined_call_operand.hbm [shape: f32[2,16,128], index: 0, kind: input, shape index: {}]   ;;  %s538_s1 = inlined_call_operand.vmem [shape: f32[2,1,1], index: 1, kind: output, shape index: {}]  }
   0x1   :  { %8 = vsyncpa [#allocation3 + $0x1], 0  ;;  %s411_s6 = smov 0   ;;  %s413_s7 = smov 0  }
   0x2   :  { %s415_s8 = smov 0   ;;  %s417_s9 = smov 0  }
   0x3   :  { %s419_s10 = smov 0   ;;  %s421_s11 = smov 0  }
   0x4 LB: > { %s243_s12 = sadd.s32 4294967295, %s395_s11   ;;  %s26_s13 = sadd.s32 1, %s391_s10  ;;  %s395_s11 = sphi %s421_s11, %s14_s11   ;;  %s391_s10 = sphi %s419_s10, %s546_s10   ;;  %s387_s9 = sphi %s417_s9, %s545_s9   ;;  %s383_s8 = sphi %s415_s8, %s544_s8   ;;  %s379_s7 = sphi %s413_s7, %s543_s7   ;;  %s375_s6 = sphi %s411_s6, %s542_s6  }
   0x5   : > { %p28_p0 = scmp.ge.s32.totalorder %s26_s13, 2  ;;  %s35_s14 = sadd.s32 1, %s383_s8 }
   0x6   : > { %p42_p1 = scmp.ne.s32.totalorder %s383_s8, %s379_s7  ;;  %p43_p2 = scmp.eq.s32.totalorder %s395_s11, 0 }
   0x7   : > { %s548_s13 = smov (%p28_p0, %s26_s13), 0  ;;  %p48_p4 = scmp.ne.s32.totalorder %s379_s7, %s375_s6 }
   0x8   : > { %p447_p3 = por %p43_p2, %p42_p1  ;;  %s30_s16 = ssub.s32 %s391_s10, %s548_s13 }
   0x9   : > { %p49_p5 = scmp.eq.s32.totalorder %s243_s12, 0  ;;  %p33_p6 = scmp.eq.s32.totalorder %s30_s16, 0 }
   0xa   : > { %p263_p8 = scmp.lt.s32.totalorder %s395_s11, 2  ;;  %s98_s19 = sand.u32 1, %s383_s8  }
   0xb   : > { %p454_p7 = por %p49_p5, %p48_p4  ;;  %s254_s20 = sshll.u32 %s391_s10, 8 }
   0xc   : > { %s460_s18 = scalar_select %p33_p6, %s383_s8, %s35_s14  }
   0xd   : > { %s247_s21 = sshll.u32 %s98_s19, 4  ;;  %s467_s24 = scalar_lea.hbm %s537_s0, %s254_s20 }
   0xe   : > { %s102_s25 = scalar_lea.vmem [#allocation2], %s247_s21  ;;  %p471_p9 = pnand %p263_p8, %p447_p3 }
   0xf   : > { %s111_s26 = sshll.u32 %s102_s25, 4  ;;  %s477_s28 = scalar_lea.sflag [#allocation3], %s98_s19  ;;  %s475_s26 = int_to_ptr.vmem [resolvable:$true] %s111_s26 }
  0x10   : > { %s315_s29 = scalar_lea.hbm %s467_s24, 256  ;;  %p317_p11 = pneg %p471_p9 }
  0x11   : > { %p316_p10 = scmp.ne.s32.totalorder %s467_s24, %s315_s29  ;;  %s320_s3 = scalar_lea.hbm %s537_s0, 512 }
  0x12   : > { %p321_p0 = scmp.lt.u32.totalorder %s467_s24, %s537_s0  ;;  %p322_p1 = scmp.lt.u32.totalorder %s320_s3, %s315_s29 }
  0x13   : > { %p318_p12 = pnand %p317_p11, %p316_p10  ;;  %p324_p3 = scmp.lt.u32.totalorder %s315_s29, %s467_s24 }
  0x14   : > { %p323_p2 = por %p322_p1, %p321_p0 }
  0x15   : > { %p319_p13 = pneg %p318_p12 }
  0x16   : > { %p325_p4 = por %p324_p3, %p323_p2 }
  0x18   : > { %p326_p5 = pnand %p325_p4, %p319_p13 }
  0x1a   : > { %329 = shalt.err (!%p326_p5)
}
  0x1b   : > { %s330_s6 = scalar_lea.vmem %s475_s26, 256  ;;  %s397_s12 = smov [#allocation2]  }
  0x1c   : > { %p331_p6 = scmp.ne.s32.totalorder %s475_s26, %s330_s6  ;;  %s335_s14 = sshll.u32 %s397_s12, 4  ;;  %s336_s14 = int_to_ptr.vmem [resolvable:$false] %s335_s14 }
  0x1d   : > { %s337_s15 = scalar_lea.vmem %s336_s14, 512  ;;  %p338_p12 = scmp.lt.s32.totalorder %s475_s26, %s336_s14 }
  0x1e   : > { %p333_p8 = pnand %p331_p6, %p317_p11  ;;  %p339_p0 = scmp.lt.s32.totalorder %s337_s15, %s330_s6 }
  0x20   : > { %p334_p10 = pneg %p333_p8  ;;  %p340_p1 = por %p339_p0, %p338_p12 }
  0x22   : > { %p341_p2 = pnand %p340_p1, %p334_p10 }
  0x24   : > { %344 = shalt.err (!%p341_p2)
}
  0x25   : > { %s398_s16 = smov 128   ;;  %s399_s19 = smov 8  }
  0x26   : > { %262 = dma.hbm_to_vmem [thread:$0]  (!%p471_p9), %s467_s24, 256, %s475_s26, %s477_s28, %s398_s16, %s398_s16, %s399_s19  }
  0x27   : > { %p250_p11 = scmp.ge.s32.totalorder %s395_s11, 1  ;;  %p119_p13 = scmp.lt.s32.totalorder %s395_s11, 3 }
  0x29   : > { %p120_p3 = pnand %p250_p11, %p119_p13 }
  0x2a   : > { %s125_s20 = sand.u32 (!%p120_p3), 1, %s379_s7  }
  0x2b   : > { %123 = sbr.rel (%p120_p3) target bundleno = 262 (0x106), region = 24  ;;  %s251_s21 = sshll.u32 (!%p120_p3), %s125_s20, 4 }
  0x2c   : > { %s126_s22 = scalar_lea.sflag (!%p120_p3), [#allocation3], %s125_s20  ;;  %s129_s23 = scalar_lea.vmem (!%p120_p3), [#allocation2], %s251_s21 }
  0x32   : > { %370 = dma.done.wait (%p454_p7), %s126_s22, 256  }
  0x33   : > { %372 = vsyncadd (%p454_p7), %s126_s22, 4294967040  ;;  %v157_v0 = vld [vmem:[%s129_s23] sm:$0xff]  ;;  %v158_v1 = vld [vmem:[%s129_s23 + $0x8] sm:$0xff]  ;;  %p147_p9 = scmp.lt.s32.totalorder %s387_s9, 1  ;;  %vm154_vm0 = vcmask 0   ;;  %v400_v3 = vmov 0.0  }
  0x34   : > { %v159_v2 = vadd.f32 %v158_v1, %v157_v0 }
  0x35   : > { %s550_s9 = smov (!%p147_p9, %s387_s9), 1 }
  0x36   : > { %160 = vadd.xlane.f32.xlu0 %v159_v2  ;;  %s149_s26 = scalar_lea.vmem %s538_s1, %s550_s9 }
  0x37   : > { %155 = vst.msk [vmem:[%s149_s26] sm:$0x1] %vm154_vm0, %v400_v3 }
  0x3e   : > { %v156_v11 = vld [vmem:[%s149_s26] sm:$0x1] }
  0xc3   : > { %v161_v4 = vpop.xlane.xlu0 %160 }
  0xc4   : > { %v162_v5 = vrot.slane %v161_v4, 4 }
  0xc6   : > { %v163_v6 = vadd.f32 %v162_v5, %v161_v4 }
  0xc8   : > { %v164_v7 = vrot.slane %v163_v6, 2 }
  0xca   : > { %v165_v8 = vadd.f32 %v164_v7, %v163_v6 }
  0xcc   : > { %v166_v9 = vrot.slane %v165_v8, 1 }
  0xce   : > { %v167_v10 = vadd.f32 %v166_v9, %v165_v8 }
  0xd0   : > { %255 = vpush %v167_v10 }
 0x101   : > { %s256_s17 = spop %255 }
 0x102   : > { %v169_v12 = vstv %s256_s17 }
 0x103   : > { %v170_v13 = vadd.f32 %v169_v12, %v156_v11 }
 0x105   : > { %172 = vst.msk [vmem:[%s149_s26] sm:$0x1] %vm154_vm0, %v170_v13 }
 0x106 PF: > { %s14_s11 = sadd.s32 1, %s395_s11   ;;  %s542_s6 = smov %s379_s7 }
 0x107   : > { %p11_p7 = scmp.ge.s32.totalorder %s14_s11, 4   ;;  %s543_s7 = smov %s383_s8 }
 0x108   : > { %s544_s8 = smov %s460_s18  ;;  %s545_s9 = smov %s391_s10 }
 0x109   : > { %s546_s10 = smov %s548_s13  ;;  %13 = sbr.rel (!%p11_p7) target bundleno = 4 (0x4), region = 68 }
 0x110   :  { %190 = vsyncpa [#allocation3], 1 }
 0x111   :  { %192 = vsyncpa [#allocation3 + $0x1], 1 }

</bundles_post_ra>
